<compile_context>
chip_gen: v7x
topology: tpu7x:2x2x1
jax: 0.10.0
libtpu: 0.0.40
codegen_flags: <defaults>
</compile_context>

<pallas_src>
import jax
import jax.numpy as jnp
from jax.experimental import pallas as pl
from jax.experimental.pallas import tpu as pltpu

LN10 = 2.302585092994045684


def imunet_kernel(x_ref, w1_ref, b1_ref, w2_ref, b2_ref, wl_ref, bl_ref,
                  rd_ref, out_ref):
    # x_ref block: (1, Cin, L)  -> one batch element, NCL layout (L on lanes)
    x = x_ref[0]                          # (Cin, L) f32
    _, L = x.shape
    L1 = L - 2
    L2 = L - 4

    # ---- Conv1d(Cin -> 32, k=3): fused im2col matmul (32, 3*Cin) @ (3*Cin, L1) ----
    xs = jnp.concatenate(
        [x[:, 0:L1], x[:, 1:L1 + 1], x[:, 2:L1 + 2]], axis=0)          # (3*Cin, L1)
    h1 = jnp.dot(w1_ref[...], xs, preferred_element_type=jnp.float32)  # (32, L1)
    h1 = jnp.maximum(h1 + b1_ref[...], 0.0)    # ReLU; Dropout = identity (eval)

    # ---- Conv1d(32 -> 32, k=3): fused im2col matmul (32, 96) @ (96, L2) ----
    hs = jnp.concatenate(
        [h1[:, 0:L2], h1[:, 1:L2 + 1], h1[:, 2:L2 + 2]], axis=0)       # (96, L2)
    h2 = jnp.dot(w2_ref[...], hs, preferred_element_type=jnp.float32)  # (32, L2)
    h2 = jnp.maximum(h2 + b2_ref[...], 0.0)    # ReLU; Dropout = identity (eval)

    # ---- Linear(32 -> y) + Tanh: (y, 32) @ (32, L2) ----
    z = jnp.tanh(jnp.dot(wl_ref[...], h2, preferred_element_type=jnp.float32)
                 + bl_ref[...])                                        # (y, L2)

    # ---- 10 ** z scaled by diag(R_pre); only the diagonal is emitted (lane-dense) ----
    out_ref[0] = jnp.exp(z * LN10) * rd_ref[...]                       # (y, L2)


def imunet_forward(obs_ncl, r_pre, params):
    """obs_ncl: (N, y_dim, L) float32 (PyTorch NCL); r_pre: (y_dim, y_dim)."""
    N, C, L = obs_ncl.shape
    y = r_pre.shape[0]
    L2 = L - 4

    x = obs_ncl.astype(jnp.float32)                                   # keep NCL
    # PyTorch Conv1d weight (out, in, k) -> fused im2col layout (out, k*in)
    w1 = jnp.transpose(params['conv1_w'], (0, 2, 1)).reshape(32, 3 * C).astype(jnp.float32)
    w2 = jnp.transpose(params['conv2_w'], (0, 2, 1)).reshape(32, 3 * 32).astype(jnp.float32)
    b1 = params['conv1_b'].reshape(32, 1).astype(jnp.float32)
    b2 = params['conv2_b'].reshape(32, 1).astype(jnp.float32)
    wl = params['lin_w'].astype(jnp.float32)                          # (y, 32)
    bl = params['lin_b'].reshape(y, 1).astype(jnp.float32)
    rd = jnp.diagonal(r_pre).reshape(y, 1).astype(jnp.float32)        # diag(R_pre)

    resident = lambda shape: pl.BlockSpec(shape, lambda n: (0,) * len(shape))

    diag_vals = pl.pallas_call(
        imunet_kernel,
        out_shape=jax.ShapeDtypeStruct((N, y, L2), jnp.float32),
        grid_spec=pltpu.PrefetchScalarGridSpec(
            num_scalar_prefetch=0,
            grid=(N,),
            in_specs=[
                pl.BlockSpec((1, C, L), lambda n: (n, 0, 0)),   # obs, one batch elem
                resident((32, 3 * C)),                          # w1 (fused)
                resident((32, 1)),                              # b1
                resident((32, 3 * 32)),                         # w2 (fused)
                resident((32, 1)),                              # b2
                resident((y, 32)),                              # linear W
                resident((y, 1)),                               # linear b
                resident((y, 1)),                               # diag(R_pre)
            ],
            out_specs=pl.BlockSpec((1, y, L2), lambda n: (n, 0, 0)),
        ),
        compiler_params=pltpu.CompilerParams(
            dimension_semantics=("parallel",),
            vmem_limit_bytes=32 * 1024 * 1024,
        ),
    )(x, w1, b1, w2, b2, wl, bl, rd)

    # Layout plumbing (outside the kernel): permute to (L-4, N, y) and diag_embed.
    p_lny = jnp.transpose(diag_vals, (2, 0, 1))                       # (L2, N, y)
    return p_lny[..., None] * jnp.eye(y, dtype=jnp.float32)           # (L2, N, y, y)


def init_params(key, y_dim):
    ks = jax.random.split(key, 6)
    u = lambda k, shape, s: jax.random.uniform(k, shape, jnp.float32, -s, s)
    params = {
        'conv1_w': u(ks[0], (32, y_dim, 3), 0.3),
        'conv1_b': u(ks[1], (32,), 0.3),
        'conv2_w': u(ks[2], (32, 32, 3), 0.1),
        'conv2_b': u(ks[3], (32,), 0.1),
        'lin_w':   u(ks[4], (y_dim, 32), 0.2) / 100.0,   # matches weight /= 100
        'lin_b':   u(ks[5], (y_dim,), 0.2) / 100.0,      # matches bias   /= 100
    }
    return params


def reference_forward(obs_ncl, r_pre, params):
    """Pure-JAX reference mirroring the PyTorch module (eval mode)."""
    x = jnp.transpose(obs_ncl, (0, 2, 1))                 # (N, L, C)
    N, L, _ = x.shape
    w1 = jnp.transpose(params['conv1_w'], (2, 1, 0))
    w2 = jnp.transpose(params['conv2_w'], (2, 1, 0))
    L1, L2 = L - 2, L - 4
    h1 = sum(jnp.einsum('nlc,co->nlo', x[:, k:k + L1, :], w1[k]) for k in range(3))
    h1 = jnp.maximum(h1 + params['conv1_b'], 0.0)
    h2 = sum(jnp.einsum('nlc,co->nlo', h1[:, k:k + L2, :], w2[k]) for k in range(3))
    h2 = jnp.maximum(h2 + params['conv2_b'], 0.0)
    y_cov = jnp.transpose(h2, (1, 0, 2))                  # (L2, N, 32)
    z = jnp.tanh(y_cov @ params['lin_w'].T + params['lin_b'])
    p = 10.0 ** z                                         # (L2, N, y)
    temp = p[..., None] * jnp.eye(p.shape[-1])
    return temp * r_pre[None, None, :, :]


if __name__ == "__main__":
    key = jax.random.PRNGKey(0)
    y_dim = 3        # e.g. 3-axis measurement noise
    N, L = 2, 16     # batch, sequence length

    k_obs, k_r, k_par = jax.random.split(key, 3)
    obs = jax.random.normal(k_obs, (N, y_dim, L), jnp.float32)        # NCL like PyTorch
    r_pre = jnp.diag(jnp.abs(jax.random.normal(k_r, (y_dim,))) + 0.5).astype(jnp.float32)
    params = init_params(k_par, y_dim)

    out = imunet_forward(obs, r_pre, params)
    out = jax.block_until_ready(out)

    ref = reference_forward(obs, r_pre, params)
    assert out.shape == (L - 4, N, y_dim, y_dim), out.shape
    assert jnp.allclose(out, ref, atol=1e-5, rtol=1e-5), "mismatch vs reference"

    print("KERNEL_OK")
</pallas_src>

<mosaic_0001>
module attributes {stable_mosaic.version = 11 : i64} {
  func.func @imunet_kernel(%arg0: i32, %arg1: memref<1x3x16xf32, #tpu.memory_space<vmem>>, %arg2: memref<32x9xf32, #tpu.memory_space<vmem>>, %arg3: memref<32x1xf32, #tpu.memory_space<vmem>>, %arg4: memref<32x96xf32, #tpu.memory_space<vmem>>, %arg5: memref<32x1xf32, #tpu.memory_space<vmem>>, %arg6: memref<3x32xf32, #tpu.memory_space<vmem>>, %arg7: memref<3x1xf32, #tpu.memory_space<vmem>>, %arg8: memref<3x1xf32, #tpu.memory_space<vmem>>, %arg9: memref<1x3x12xf32, #tpu.memory_space<vmem>>) attributes {dimension_semantics = [#tpu.dimension_semantics<parallel>], iteration_bounds = array<i64: 2>, scalar_prefetch = 0 : i64, scratch_operands = 0 : i64, tpu.core_type = #tpu.core_type<tc>, window_params = [{transform_indices = @transform_0, window_bounds = array<i64: 1, 3, 16>}, {pipeline_mode = #tpu.pipeline_mode<synchronous>, transform_indices = @transform_1, window_bounds = array<i64: 32, 9>}, {pipeline_mode = #tpu.pipeline_mode<synchronous>, transform_indices = @transform_2, window_bounds = array<i64: 32, 1>}, {pipeline_mode = #tpu.pipeline_mode<synchronous>, transform_indices = @transform_3, window_bounds = array<i64: 32, 96>}, {pipeline_mode = #tpu.pipeline_mode<synchronous>, transform_indices = @transform_4, window_bounds = array<i64: 32, 1>}, {pipeline_mode = #tpu.pipeline_mode<synchronous>, transform_indices = @transform_5, window_bounds = array<i64: 3, 32>}, {pipeline_mode = #tpu.pipeline_mode<synchronous>, transform_indices = @transform_6, window_bounds = array<i64: 3, 1>}, {pipeline_mode = #tpu.pipeline_mode<synchronous>, transform_indices = @transform_7, window_bounds = array<i64: 3, 1>}, {transform_indices = @transform_8, window_bounds = array<i64: 1, 3, 12>}]} {
    %c0 = arith.constant 0 : index
    %c0_0 = arith.constant 0 : index
    %c0_1 = arith.constant 0 : index
    %0 = vector.load %arg1[%c0, %c0_0, %c0_1] : memref<1x3x16xf32, #tpu.memory_space<vmem>>, vector<1x3x16xf32>
    %1 = vector.shape_cast %0 : vector<1x3x16xf32> to vector<3x16xf32>
    %2 = vector.extract_strided_slice %1 {offsets = [0, 0], sizes = [3, 14], strides = [1, 1]} : vector<3x16xf32> to vector<3x14xf32>
    %3 = vector.extract_strided_slice %1 {offsets = [0, 1], sizes = [3, 14], strides = [1, 1]} : vector<3x16xf32> to vector<3x14xf32>
    %4 = vector.extract_strided_slice %1 {offsets = [0, 2], sizes = [3, 14], strides = [1, 1]} : vector<3x16xf32> to vector<3x14xf32>
    %5 = tpu.concatenate %2, %3, %4 in 0 : vector<3x14xf32>, vector<3x14xf32>, vector<3x14xf32> -> vector<9x14xf32>
    %c0_2 = arith.constant 0 : index
    %c0_3 = arith.constant 0 : index
    %6 = vector.load %arg2[%c0_2, %c0_3] : memref<32x9xf32, #tpu.memory_space<vmem>>, vector<32x9xf32>
    %cst = arith.constant dense<0.000000e+00> : vector<32x14xf32>
    %7 = tpu.matmul %6, %5, %cst {dimension_numbers = #tpu.dot_dimension_numbers<[1], [0], [0], [1], [0, 0, 1, 1], [], []>} : vector<32x9xf32>, vector<9x14xf32>, vector<32x14xf32> -> vector<32x14xf32>
    %c0_4 = arith.constant 0 : index
    %c0_5 = arith.constant 0 : index
    %8 = vector.load %arg3[%c0_4, %c0_5] : memref<32x1xf32, #tpu.memory_space<vmem>>, vector<32x1xf32>
    %9 = vector.broadcast %8 : vector<32x1xf32> to vector<32x14xf32>
    %10 = arith.addf %7, %9 : vector<32x14xf32>
    %cst_6 = arith.constant 0.000000e+00 : f32
    %11 = vector.broadcast %cst_6 : f32 to vector<32x14xf32>
    %12 = arith.maximumf %10, %11 : vector<32x14xf32>
    %13 = vector.extract_strided_slice %12 {offsets = [0, 0], sizes = [32, 12], strides = [1, 1]} : vector<32x14xf32> to vector<32x12xf32>
    %14 = vector.extract_strided_slice %12 {offsets = [0, 1], sizes = [32, 12], strides = [1, 1]} : vector<32x14xf32> to vector<32x12xf32>
    %15 = vector.extract_strided_slice %12 {offsets = [0, 2], sizes = [32, 12], strides = [1, 1]} : vector<32x14xf32> to vector<32x12xf32>
    %16 = tpu.concatenate %13, %14, %15 in 0 : vector<32x12xf32>, vector<32x12xf32>, vector<32x12xf32> -> vector<96x12xf32>
    %c0_7 = arith.constant 0 : index
    %c0_8 = arith.constant 0 : index
    %17 = vector.load %arg4[%c0_7, %c0_8] : memref<32x96xf32, #tpu.memory_space<vmem>>, vector<32x96xf32>
    %cst_9 = arith.constant dense<0.000000e+00> : vector<32x12xf32>
    %18 = tpu.matmul %17, %16, %cst_9 {dimension_numbers = #tpu.dot_dimension_numbers<[1], [0], [0], [1], [0, 0, 1, 1], [], []>} : vector<32x96xf32>, vector<96x12xf32>, vector<32x12xf32> -> vector<32x12xf32>
    %c0_10 = arith.constant 0 : index
    %c0_11 = arith.constant 0 : index
    %19 = vector.load %arg5[%c0_10, %c0_11] : memref<32x1xf32, #tpu.memory_space<vmem>>, vector<32x1xf32>
    %20 = vector.broadcast %19 : vector<32x1xf32> to vector<32x12xf32>
    %21 = arith.addf %18, %20 : vector<32x12xf32>
    %cst_12 = arith.constant 0.000000e+00 : f32
    %22 = vector.broadcast %cst_12 : f32 to vector<32x12xf32>
    %23 = arith.maximumf %21, %22 : vector<32x12xf32>
    %c0_13 = arith.constant 0 : index
    %c0_14 = arith.constant 0 : index
    %24 = vector.load %arg6[%c0_13, %c0_14] : memref<3x32xf32, #tpu.memory_space<vmem>>, vector<3x32xf32>
    %cst_15 = arith.constant dense<0.000000e+00> : vector<3x12xf32>
    %25 = tpu.matmul %24, %23, %cst_15 {dimension_numbers = #tpu.dot_dimension_numbers<[1], [0], [0], [1], [0, 0, 1, 1], [], []>} : vector<3x32xf32>, vector<32x12xf32>, vector<3x12xf32> -> vector<3x12xf32>
    %c0_16 = arith.constant 0 : index
    %c0_17 = arith.constant 0 : index
    %26 = vector.load %arg7[%c0_16, %c0_17] : memref<3x1xf32, #tpu.memory_space<vmem>>, vector<3x1xf32>
    %27 = vector.broadcast %26 : vector<3x1xf32> to vector<3x12xf32>
    %28 = arith.addf %25, %27 : vector<3x12xf32>
    %29 = math.tanh %28 : vector<3x12xf32>
    %cst_18 = arith.constant 2.30258512 : f32
    %30 = vector.broadcast %cst_18 : f32 to vector<3x12xf32>
    %31 = arith.mulf %29, %30 : vector<3x12xf32>
    %32 = math.exp %31 : vector<3x12xf32>
    %c0_19 = arith.constant 0 : index
    %c0_20 = arith.constant 0 : index
    %33 = vector.load %arg8[%c0_19, %c0_20] : memref<3x1xf32, #tpu.memory_space<vmem>>, vector<3x1xf32>
    %34 = vector.broadcast %33 : vector<3x1xf32> to vector<3x12xf32>
    %35 = arith.mulf %32, %34 : vector<3x12xf32>
    %c0_21 = arith.constant 0 : index
    %c0_22 = arith.constant 0 : index
    %c0_23 = arith.constant 0 : index
    %36 = vector.load %arg9[%c0_21, %c0_22, %c0_23] : memref<1x3x12xf32, #tpu.memory_space<vmem>>, vector<1x3x12xf32>
    %37 = vector.shape_cast %36 : vector<1x3x12xf32> to vector<3x12xf32>
    %38 = vector.shape_cast %35 : vector<3x12xf32> to vector<1x3x12xf32>
    tpu.vector_store %arg9[%c0_21, %c0_22, %c0_23], %38 {strides = array<i32>} : memref<1x3x12xf32, #tpu.memory_space<vmem>>, vector<1x3x12xf32>,
    return
  }
  func.func @transform_0(%arg0: i32) -> (i32, i32, i32) {
    %c0_i32 = arith.constant 0 : i32
    %c0_i32_0 = arith.constant 0 : i32
    %c0_i32_1 = arith.constant 0 : i32
    return %arg0, %c0_i32, %c0_i32_0 : i32, i32, i32
  }
  func.func @transform_1(%arg0: i32) -> (i32, i32) {
    %c0_i32 = arith.constant 0 : i32
    %c0_i32_0 = arith.constant 0 : i32
    %c0_i32_1 = arith.constant 0 : i32
    return %c0_i32, %c0_i32_0 : i32, i32
  }
  func.func @transform_2(%arg0: i32) -> (i32, i32) {
    %c0_i32 = arith.constant 0 : i32
    %c0_i32_0 = arith.constant 0 : i32
    %c0_i32_1 = arith.constant 0 : i32
    return %c0_i32, %c0_i32_0 : i32, i32
  }
  func.func @transform_3(%arg0: i32) -> (i32, i32) {
    %c0_i32 = arith.constant 0 : i32
    %c0_i32_0 = arith.constant 0 : i32
    %c0_i32_1 = arith.constant 0 : i32
    return %c0_i32, %c0_i32_0 : i32, i32
  }
  func.func @transform_4(%arg0: i32) -> (i32, i32) {
    %c0_i32 = arith.constant 0 : i32
    %c0_i32_0 = arith.constant 0 : i32
    %c0_i32_1 = arith.constant 0 : i32
    return %c0_i32, %c0_i32_0 : i32, i32
  }
  func.func @transform_5(%arg0: i32) -> (i32, i32) {
    %c0_i32 = arith.constant 0 : i32
    %c0_i32_0 = arith.constant 0 : i32
    %c0_i32_1 = arith.constant 0 : i32
    return %c0_i32, %c0_i32_0 : i32, i32
  }
  func.func @transform_6(%arg0: i32) -> (i32, i32) {
    %c0_i32 = arith.constant 0 : i32
    %c0_i32_0 = arith.constant 0 : i32
    %c0_i32_1 = arith.constant 0 : i32
    return %c0_i32, %c0_i32_0 : i32, i32
  }
  func.func @transform_7(%arg0: i32) -> (i32, i32) {
    %c0_i32 = arith.constant 0 : i32
    %c0_i32_0 = arith.constant 0 : i32
    %c0_i32_1 = arith.constant 0 : i32
    return %c0_i32, %c0_i32_0 : i32, i32
  }
  func.func @transform_8(%arg0: i32) -> (i32, i32, i32) {
    %c0_i32 = arith.constant 0 : i32
    %c0_i32_0 = arith.constant 0 : i32
    %c0_i32_1 = arith.constant 0 : i32
    return %arg0, %c0_i32, %c0_i32_0 : i32, i32, i32
  }
}

</mosaic_0001>

<bundles_post_ra>
// kernel: tpu_custom_call.1
= control target key start
LH: loop header
LB: loop body
LE: loop exit
PB: predicated region body
PF: predicated region fallthrough
CT: control target
= control target key end

     0   :  { %s987_s27 = smov 0   ;;  %s1082_s0 = inlined_call_operand.vmem [shape: f32[2,3,16], index: 0, kind: input, shape index: {}]   ;;  %s1083_s1 = inlined_call_operand.vmem [shape: f32[32,9], index: 1, kind: input, shape index: {}]   ;;  %s1084_s2 = inlined_call_operand.vmem [shape: f32[32,1], index: 2, kind: input, shape index: {}]   ;;  %s1085_s3 = inlined_call_operand.vmem [shape: f32[32,96], index: 3, kind: input, shape index: {}]   ;;  %s1086_s4 = inlined_call_operand.vmem [shape: f32[32,1], index: 4, kind: input, shape index: {}]   ;;  %s1087_s5 = inlined_call_operand.vmem [shape: f32[3,32], index: 5, kind: input, shape index: {}]   ;;  %s1088_s6 = inlined_call_operand.vmem [shape: f32[3,1], index: 6, kind: input, shape index: {}]   ;;  %s1089_s7 = inlined_call_operand.vmem [shape: f32[3,1], index: 7, kind: input, shape index: {}]   ;;  %s1090_s8 = inlined_call_operand.vmem [shape: f32[2,3,12], index: 8, kind: output, shape index: {}]  }
   0x1 LB: > { %s753_s28 = sadd.s32 4294967295, %s933_s27   ;;  %p757_p0 = scmp.ge.s32.totalorder %s933_s27, 1  ;;  %s933_s27 = sphi %s987_s27, %s18_s27  }
   0x2   : > { %p261_p1 = scmp.lt.s32.totalorder %s933_s27, 3 }
   0x4   : > { %p262_p2 = pnand %p757_p0, %p261_p1 }
   0x5   : > { %p293_p3 = scmp.lt.s32.totalorder (!%p262_p2), %s753_s28, 1  ;;  %v315_v0 = vld [vmem:[%s1083_s1] sm:$0xff] (!%p262_p2)  ;;  %vm343_vm0 = vcmask (!%p262_p2), 72704   ;;  %s935_s13 = smov (!%p262_p2), 127   ;;  %v936_v5 = vmov (!%p262_p2), 0   ;;  %v320_v6 = vld [vmem:[%s1084_s2 + $0x8] sm:$0xff] (!%p262_p2) }
   0x6   : > { %265 = sbr.rel (%p262_p2) target bundleno = 968 (0x3c8), region = 52  ;;  %803 = vmatprep.mubr.msk.f32.mxu0 (!%p262_p2), %vm343_vm0, %v315_v0  ;;  %v319_v4 = vld [vmem:[%s1084_s2] sm:$0xff] (!%p262_p2)  ;;  %901 = vset.pattern.permute.xlu1 (!%p262_p2), %v936_v5  ;;  %s937_s16 = smov (!%p262_p2), 126   ;;  %v321_v7 = vld [vmem:[%s1084_s2 + $0x10] sm:$0xff] (!%p262_p2)  ;;  %v322_v8 = vld [vmem:[%s1084_s2 + $0x18] sm:$0xff] (!%p262_p2)  ;;  %vm311_vm1 = vcmask (!%p262_p2), 1042432  }
   0x7   : > { %902 = vset.pattern.permute.xlu0 (!%p262_p2), %v936_v5  ;;  %325 = vperm.xlu1 (!%p262_p2), %901, %v319_v4   ;;  %vm313_vm2 = vcmask (!%p262_p2), 1045504   ;;  %vm356_vm3 = vcmask (!%p262_p2), 1040384   ;;  %vm938_vm4 = vmmov (!%p262_p2), 1   ;;  %v316_v14 = vld [vmem:[%s1083_s1 + $0x8] sm:$0xff] (!%p262_p2)  ;;  %v317_v15 = vld [vmem:[%s1083_s1 + $0x10] sm:$0xff] (!%p262_p2)  ;;  %v318_v16 = vld [vmem:[%s1083_s1 + $0x18] sm:$0xff] (!%p262_p2) }
   0x8   : > { %vm851_vm5 = vmpackc.low (!%p262_p2), %vm356_vm3, %vm938_vm4  ;;  %v476_v37 = vld [vmem:[%s1085_s3] sm:$0xff] (!%p262_p2)  ;;  %vm504_vm6 = vcmask (!%p262_p2), 785408   ;;  %v482_v39 = vld [vmem:[%s1086_s4 + $0x10] sm:$0xff] (!%p262_p2)  ;;  %v939_v63 = vmov (!%p262_p2), 0.0|0.0   ;;  %vm940_vm7 = vmmov (!%p262_p2), 0   ;;  %v941_v0 = vmov (!%p262_p2), 0.0  }
   0x9   : > { %v480_v38 = vld [vmem:[%s1086_s4] sm:$0xff] (!%p262_p2)  ;;  %833 = vmatprep.mubr.msk.f32.mxu1 (!%p262_p2), %vm504_vm6, %v476_v37  ;;  %v481_v40 = vld [vmem:[%s1086_s4 + $0x8] sm:$0xff] (!%p262_p2)  ;;  %v483_v42 = vld [vmem:[%s1086_s4 + $0x18] sm:$0xff] (!%p262_p2)  ;;  %vm613_vm8 = vcmask (!%p262_p2), 261120   ;;  %vm698_vm9 = vcmask (!%p262_p2), 92160  }
   0xa   : > { %v607_v41 = vld [vmem:[%s1088_s6] sm:$0x7] (!%p262_p2)  ;;  %v477_v60 = vld [vmem:[%s1085_s3 + $0x8] sm:$0xff] (!%p262_p2)  ;;  %v478_v61 = vld [vmem:[%s1085_s3 + $0x10] sm:$0xff] (!%p262_p2) }
   0xb   : > { %330 = vperm.xlu1 (!%p262_p2), %901, %v320_v6   ;;  %v691_v43 = vld [vmem:[%s1089_s7] sm:$0x7] (!%p262_p2)  ;;  %v479_v62 = vld [vmem:[%s1085_s3 + $0x18] sm:$0xff] (!%p262_p2) }
   0xd   : > { %s1092_s28 = smov (!%p293_p3, %s753_s28), 1 }
   0xe   : > { %s758_s29 = sshll.u32 %s1092_s28, 2 }
   0xf   : > { %s296_s12 = scalar_lea.vmem %s1082_s0, %s758_s29  ;;  %340 = vperm.xlu1 %901, %v322_v8   ;;  %s300_s17 = scalar_lea.vmem %s1090_s8, %s758_s29 }
  0x10   : > { %v301_v1 = vld [vmem:[%s296_s12] sm:$0x7] }
  0x11   : > { %v303_v2 = vrot.slane %v301_v1, 5  ;;  %v307_v3 = vrot.slane %v301_v1, 2 }
  0x13   : > { %304 = vrot.lane.b32.xlu0 %v303_v2, %s935_s13 }
  0x17   : > { %308 = vrot.lane.b32.xlu0 %v307_v3, %s937_s16 }
  0x1b   : > { %335 = vperm.xlu0 %902, %v321_v7  }
  0x85   : > { %v305_v9 = vpop.permute.xlu0 %304 }
  0x86   : > { %v312_v10 = vsel %vm311_vm1, %v301_v1, %v305_v9  ;;  %v326_v17 = vpop.permute.xlu1 %325 }
  0x89   : > { %v309_v11 = vpop.permute.xlu0 %308 }
  0x8a   : > { %v314_v12 = vsel %vm313_vm2, %v312_v10, %v309_v11  ;;  %v331_v18 = vpop.permute.xlu1 %330 }
  0x8b   : > { %v850_v13 = vpack.c.bf16 %v309_v11, %v314_v12 }
  0x8d   : > { %852 = vmatprep.subr.msk.bf16.mxu0 %vm851_vm5, %v850_v13 }
  0x8e   : > { %855 = vmatpush3.bf16.msk.msra.mxu0 %vm851_vm5, %v850_v13  ;;  %v341_v25 = vpop.permute.xlu1 %340 }
  0x8f   : > { %880 = vmatprep.subr.bf16.mxu0 %v939_v63 }
  0x91   : > { %804 = vmatmul.mubr.msk.f32.vlgmr.msra.gmra.mrb[0].mxu0 %vm343_vm0, %v316_v14 }
  0x92   : > { %806 = vmatprep.mubr.msk.f32.mxu0 %vm343_vm0, %v317_v15 }
  0x95   : > { %807 = vmatmul.mubr.msk.f32.gmra.mrb[2].mxu0 %vm343_vm0, %v318_v16 }
  0x96   : > { %847 = vmatprep.mubr.msk.f32.mxu0 %vm940_vm7, %v941_v0 }
  0x9a   : > { %v336_v24 = vpop.permute.xlu0 %335 }
 0x164   : > { %v805_v19 = vpop.f32.mrb[0].mxu0 }
 0x165   : > { %v431_v20 = vadd.f32 %v805_v19, %v331_v18  ;;  %v425_v21 = vpop.f32.mrb[1].mxu0  ;;  %v606_v19 = vld [vmem:[%s1087_s5] sm:$0x7] }
 0x166   : > { %v426_v22 = vadd.f32 %v425_v21, %v326_v17 }
 0x167   : > { %v445_v23 = vmax.f32 %v431_v20, 0.0 }
 0x168   : > { %v444_v26 = vmax.f32 %v426_v22, 0.0  ;;  %v808_v27 = vpop.f32.mrb[2].mxu0 }
 0x169   : > { %v441_v28 = vadd.f32 %v808_v27, %v341_v25  ;;  %v435_v29 = vpop.f32.mrb[3].mxu0 }
 0x16a   : > { %v436_v30 = vadd.f32 %v435_v29, %v336_v24  ;;  %v903_v31 = vpack.i.bf16 %v445_v23, %v444_v26  ;;  %v856_v32 = vpack.c.bf16 %v445_v23, %v444_v26 }
 0x16b   : > { %v447_v33 = vmax.f32 %v441_v28, 0.0 }
 0x16c   : > { %v446_v34 = vmax.f32 %v436_v30, 0.0  ;;  %904 = vrot.lane.b32.xlu1 %v903_v31, %s935_s13  ;;  %857 = vmatprep.subr.bf16.mxu1 %v856_v32 }
 0x16d   : > { %859 = vmatpush3.bf16.msra.mxu1 %v856_v32 }
 0x16e   : > { %v908_v35 = vpack.i.bf16 %v447_v33, %v446_v34  ;;  %v860_v36 = vpack.c.bf16 %v447_v33, %v446_v34 }
 0x170   : > { %914 = vrot.lane.b32.xlu1 %v903_v31, %s937_s16  ;;  %909 = vrot.lane.b32.xlu0 %v908_v35, %s935_s13 }
 0x171   : > { %861 = vmatprep.subr.bf16.mxu1 %v860_v36 }
 0x172   : > { %863 = vmatpush3.bf16.msra.mxu1 %v860_v36 }
 0x174   : > { %486 = vperm.xlu1 %901, %v480_v38   ;;  %919 = vrot.lane.b32.xlu0 %v908_v35, %s937_s16 }
 0x178   : > { %496 = vperm.xlu1 %901, %v482_v39   ;;  %491 = vperm.xlu0 %902, %v481_v40  }
 0x17c   : > { %610 = vperm.xlu1 %901, %v607_v41   ;;  %501 = vperm.xlu0 %902, %v483_v42  }
 0x180   : > { %694 = vperm.xlu0 %902, %v691_v43  }
 0x1de   : > { %v905_v44 = vpop.permute.xlu1 %904 }
 0x1df   : > { %v907_v45 = vunpack.i.h.bf16 %v905_v44  ;;  %v906_v46 = vunpack.i.l.bf16 %v905_v44 }
 0x1e1   : > { %v864_v47 = vpack.c.bf16 %v907_v45, %v906_v46 }
 0x1e2   : > { %v915_v48 = vpop.permute.xlu1 %914  ;;  %v910_v49 = vpop.permute.xlu0 %909 }
 0x1e3   : > { %v917_v50 = vunpack.i.h.bf16 %v915_v48  ;;  %v916_v51 = vunpack.i.l.bf16 %v915_v48  ;;  %v912_v52 = vunpack.i.h.bf16 %v910_v49  ;;  %v911_v53 = vunpack.i.l.bf16 %v910_v49  ;;  %865 = vmatprep.subr.bf16.mxu1 %v864_v47 }
 0x1e4   : > { %867 = vmatpush3.bf16.msra.mxu1 %v864_v47 }
 0x1e5   : > { %v868_v54 = vpack.c.bf16 %v912_v52, %v911_v53  ;;  %v872_v56 = vpack.c.bf16 %v917_v50, %v916_v51 }
 0x1e6   : > { %v920_v55 = vpop.permute.xlu0 %919 }
 0x1e7   : > { %v922_v57 = vunpack.i.h.bf16 %v920_v55  ;;  %v921_v58 = vunpack.i.l.bf16 %v920_v55  ;;  %869 = vmatprep.subr.bf16.mxu1 %v868_v54 }
 0x1e8   : > { %871 = vmatpush3.bf16.msra.mxu1 %v868_v54 }
 0x1e9   : > { %873 = vmatprep.subr.bf16.mxu1 %v872_v56  ;;  %v876_v59 = vpack.c.bf16 %v922_v57, %v921_v58 }
 0x1ec   : > { %875 = vmatpush3.bf16.msra.mxu1 %v872_v56 }
 0x1ed   : > { %877 = vmatprep.subr.bf16.mxu1 %v876_v59 }
 0x1f0   : > { %879 = vmatpush3.bf16.msra.mxu1 %v876_v59 }
 0x1f3   : > { %834 = vmatmul.mubr.msk.f32.vlgmr.msra.gmra.mrb[0].mxu1 %vm504_vm6, %v477_v60  ;;  %v487_v2 = vpop.permute.xlu1 %486 }
 0x1f4   : > { %836 = vmatprep.mubr.msk.f32.mxu1 %vm504_vm6, %v478_v61 }
 0x1f7   : > { %837 = vmatmul.mubr.msk.f32.gmra.mrb[2].mxu1 %vm504_vm6, %v479_v62  ;;  %v492_v1 = vpop.permute.xlu0 %491  ;;  %v497_v11 = vpop.permute.xlu1 %496 }
 0x1fb   : > { %v502_v8 = vpop.permute.xlu0 %501  ;;  %v611_v20 = vpop.permute.xlu1 %610 }
 0x1ff   : > { %v695_v28 = vpop.permute.xlu0 %694 }
 0x2c6   : > { %v835_v3 = vpop.f32.mrb[0].mxu1 }
 0x2c7   : > { %v589_v4 = vadd.f32 %v835_v3, %v492_v1  ;;  %v583_v5 = vpop.f32.mrb[1].mxu1 }
 0x2c8   : > { %v584_v6 = vadd.f32 %v583_v5, %v487_v2 }
 0x2c9   : > { %v603_v7 = vmax.f32 %v589_v4, 0.0 }
 0x2ca   : > { %v602_v9 = vmax.f32 %v584_v6, 0.0  ;;  %v838_v10 = vpop.f32.mrb[2].mxu1 }
 0x2cb   : > { %v599_v12 = vadd.f32 %v838_v10, %v502_v8  ;;  %v593_v13 = vpop.f32.mrb[3].mxu1 }
 0x2cc   : > { %v881_v14 = vpack.c.bf16 %v603_v7, %v602_v9  ;;  %v594_v15 = vadd.f32 %v593_v13, %v497_v11 }
 0x2cd   : > { %v605_v16 = vmax.f32 %v599_v12, 0.0 }
 0x2ce   : > { %v604_v17 = vmax.f32 %v594_v15, 0.0  ;;  %882 = vmatpush3.bf16.msra.mxu0 %v881_v14 }
 0x2cf   : > { %883 = vmatprep.subr.bf16.mxu0 %v939_v63 }
 0x2d0   : > { %v884_v18 = vpack.c.bf16 %v605_v16, %v604_v17 }
 0x2d2   : > { %885 = vmatpush3.bf16.msra.mxu0 %v884_v18 }
 0x2d5   : > { %848 = vmatmul.mubr.msk.f32.vlgmr.msra.gmra.mrb[4].mxu0 %vm613_vm8, %v606_v19 }
 0x3a8   : > { %v683_v21 = vpop.f32.mrb[4].mxu0 }
 0x3a9   : > { %v684_v22 = vadd.f32 %v683_v21, %v611_v20  ;;  %v849_v23 = vpop.f32.mrb[5].mxu0 }
 0x3ab   : > { %923 = vtanh.f32 %v684_v22 }
 0x3b5   : > { %v924_v24 = vpop.eup %923 }
 0x3b6   : > { %v688_v25 = vmul.f32 2.3025851, %v924_v24 }
 0x3b8   : > { %v689_v26 = vmul.f32 1.442695, %v688_v25 }
 0x3ba   : > { %925 = vpow2.f32 %v689_v26 }
 0x3c4   : > { %v926_v27 = vpop.eup %925 }
 0x3c5   : > { %v697_v29 = vmul.f32 %v926_v27, %v695_v28 }
 0x3c7   : > { %699 = vst.msk [vmem:[%s300_s17] sm:$0x7] %vm698_vm9, %v697_v29 }
 0x3c8 PF: > { %s18_s27 = sadd.s32 1, %s933_s27  }
 0x3c9   : > { %p15_p4 = scmp.ge.s32.totalorder %s18_s27, 4  }
 0x3cb   :  { %17 = sbr.rel (!%p15_p4) target bundleno = 1 (0x1), region = 82 }

</bundles_post_ra>
